<compile_context>
chip_gen: v5e
topology: v5e:2x2
jax: 0.10.0
libtpu: 0.0.40
codegen_flags: <defaults>
</compile_context>

<pallas_src>
import jax
import jax.numpy as jnp
from jax.experimental import pallas as pl
from jax.experimental.pallas import tpu as pltpu


def _round_up(x, m):
    return ((x + m - 1) // m) * m


def _vmem_capacity_bytes():
    """Per-TensorCore VMEM capacity; falls back to the v7x 64 MiB floor."""
    try:
        cap = getattr(pltpu.get_tpu_info(), "vmem_capacity_bytes", None)
        if cap:
            return int(cap)
    except Exception:
        pass
    return 64 << 20


def _pick_batch_tile(B, F, H, x_bytes, w_bytes, budget):
    """Lane-aligned batch tile sized against the FULL per-step VMEM footprint."""
    Fp = _round_up(max(F, 1), 128)  # lane padding of the feature axis in VMEM

    def need(tb):
        x_tiles = 2 * tb * Fp * x_bytes                    # double-buffered x tile
        w_res = H * Fp * w_bytes                           # resident w1^T (single-buffered)
        cols = 2 * H * 128 * 4                             # b1 / w2 lane-padded (H,1) columns
        h_tmp = H * tb * 4                                 # (H, TB) f32 intermediate
        x_cast = tb * Fp * (2 if (w_bytes == 2 and x_bytes == 4) else 0)  # in-kernel bf16 copy
        outs = 2 * 8 * tb * 4                              # packed (3,TB) out, sublane-padded, x2 buffers
        return x_tiles + w_res + cols + h_tmp + x_cast + outs + (2 << 20)

    tb = 2048                                              # big tiles amortize per-step overhead (v5e/v6e)
    while tb > 128 and need(tb) > budget:
        tb //= 2
    tb = min(tb, _round_up(B, 128))
    # v7x megacore: keep >= 2 grid steps on the "parallel" batch axis when possible.
    if B > 128 and pl.cdiv(B, tb) < 2:
        tb = max(128, _round_up(-(-B // 2), 128))
    return tb


def _make_kernel(B, TB, cast_dtype, mask_tail):
    def kernel(wd_ref, b2_ref, x_ref, w1t_ref, b1_ref, w2_ref, y_ref, out_ref):
        # --- predict(): Linear(F,H) -> ReLU -> Linear(H,1), batch kept on lanes ---
        x = x_ref[...]                                     # (TB, F), native (B, F) layout
        if cast_dtype is not None and x.dtype != cast_dtype:
            x = x.astype(cast_dtype)                       # in-kernel cast; HBM read stays source dtype
        # Contract over F with both operands in natural layout (NT matmul); Mosaic
        # handles the (TB,F)->(F,TB) swap in VMEM, h lands as (H, TB) = batch on lanes.
        h = jax.lax.dot_general(
            w1t_ref[...], x, (((1,), (1,)), ((), ())),
            preferred_element_type=jnp.float32)            # (H, TB), MXU
        h = jnp.maximum(h + b1_ref[...], 0.0)              # bias + ReLU (VPU)

        # H -> 1 projection: VPU multiply + sublane (XLU) reduction; keeps the MXU
        # free of a 1-column matmul that would be >99% padding.
        raw = jnp.sum(h * w2_ref[...], axis=0, keepdims=True) + b2_ref[0, 0]   # (1, TB)

        # --- sigmoid (exp + reciprocal ride the EUP slot) ---
        p = pl.reciprocal(1.0 + jnp.exp(-raw))

        # --- weighted binary cross-entropy, per example ---
        y = y_ref[...]                                     # (1, TB) f32
        w = jnp.where(y != 0.0, y, wd_ref[0, 0])           # labels.masked_fill_(~labels.bool(), wd)
        # Stable log-sigmoid computed from `raw`, clamped at -100 to match torch BCE's
        # log clamp.  (torch takes log of the rounded probability, so the clamp engages
        # at marginally different |raw|; numerically equivalent at f32 for finite input.)
        t = jnp.log(1.0 + jnp.exp(-jnp.abs(raw)))          # softplus tail, z in (0, 1]
        log_p = jnp.maximum(-(jnp.maximum(-raw, 0.0) + t), -100.0)    # log(sigmoid(raw))
        log_1mp = jnp.maximum(-(jnp.maximum(raw, 0.0) + t), -100.0)   # log(1 - sigmoid(raw))
        wbce = w * -(y * log_p + (1.0 - y) * log_1mp)
        if mask_tail:
            lane = jax.lax.broadcasted_iota(jnp.int32, (1, TB), 1) + pl.program_id(0) * TB
            wbce = jnp.where(lane < B, wbce, 0.0)          # zero padded batch columns

        # Single packed lane-dense output tile: row0=raw, row1=sigmoid, row2=weighted BCE.
        out_ref[0:1, :] = raw
        out_ref[1:2, :] = p
        out_ref[2:3, :] = wbce

    return kernel


def _noid_pallas_call(kernel, nb, TB, F, H, B_pad, vmem_limit, single_buffer_weights):
    resident_kw = dict(pipeline_mode=pl.Buffered(1)) if single_buffer_weights else {}
    smem_spec = pl.BlockSpec(memory_space=pltpu.MemorySpace.SMEM)
    return pl.pallas_call(
        kernel,
        out_shape=jax.ShapeDtypeStruct((3, B_pad), jnp.float32),
        grid=(nb,),
        in_specs=[
            smem_spec,                                               # weight_decay (1,1)
            smem_spec,                                               # b2 (1,1)
            pl.BlockSpec((TB, F), lambda i: (i, 0)),                 # x tile, native (B,F) layout
            pl.BlockSpec((H, F), lambda i: (0, 0), **resident_kw),   # w1^T (grid-invariant)
            pl.BlockSpec((H, 1), lambda i: (0, 0), **resident_kw),   # b1 column
            pl.BlockSpec((H, 1), lambda i: (0, 0), **resident_kw),   # w2 column
            pl.BlockSpec((1, TB), lambda i: (0, i)),                 # labels tile
        ],
        out_specs=pl.BlockSpec((3, TB), lambda i: (0, i)),
        compiler_params=pltpu.CompilerParams(
            dimension_semantics=("parallel",),
            vmem_limit_bytes=vmem_limit,
        ),
    )


def noid_forward(finputs, idinputs, labels, indexes, params, weight_decay, *,
                 use_bf16_matmul=False):
    """NoID.forward: predict -> sigmoid -> weighted BCE.  Returns dict(loss, logits, raw[, indexes])."""
    del idinputs  # NoID.predict ignores idinputs.
    B, F = finputs.shape
    w1, b1, w2, b2 = params["w1"], params["b1"], params["w2"], params["b2"]
    H = w1.shape[1]

    w_dtype = jnp.bfloat16 if use_bf16_matmul else jnp.float32
    x_bytes = jnp.dtype(finputs.dtype).itemsize
    w_bytes = jnp.dtype(w_dtype).itemsize

    cap = _vmem_capacity_bytes()                        # generation-aware (64 MiB v7x, 128 MiB v5e/v6e)
    vmem_limit = min(int(cap * 0.85), 100 << 20)
    budget = int(vmem_limit * 0.85)
    TB = _pick_batch_tile(B, F, H, x_bytes, w_bytes, budget)
    nb = pl.cdiv(B, TB)
    B_pad = nb * TB

    # x keeps its native (B, F) layout and dtype: no wrapper transpose/cast pass over
    # the dominant HBM operand.  Pad only when the batch isn't tile-aligned (callers
    # should prefer B % 128 == 0 to skip this copy); padded columns are masked in-kernel.
    x_in = finputs if B_pad == B else jnp.pad(finputs, ((0, B_pad - B), (0, 0)))
    y_row = labels.astype(jnp.float32).reshape(1, B)
    if B_pad != B:
        y_row = jnp.pad(y_row, ((0, 0), (0, B_pad - B)))

    w1t = w1.astype(w_dtype).T                          # (H, F): one-time, small
    b1c = b1.reshape(H, 1).astype(jnp.float32)          # (H, 1)
    w2c = w2.reshape(H, 1).astype(jnp.float32)          # (H, 1)
    b2s = jnp.asarray(b2, jnp.float32).reshape(1, 1)    # SMEM scalar
    wds = jnp.full((1, 1), weight_decay, jnp.float32)   # SMEM scalar

    kernel = _make_kernel(B, TB,
                          jnp.bfloat16 if use_bf16_matmul else None,
                          mask_tail=(B_pad != B))
    args = (wds, b2s, x_in, w1t, b1c, w2c, y_row)
    try:
        packed = _noid_pallas_call(kernel, nb, TB, F, H, B_pad, vmem_limit,
                                   single_buffer_weights=True)(*args)
    except Exception:
        # Fallback for jax builds where pl.Buffered(1) single-buffering of the
        # grid-invariant weight operands is not accepted by the TPU pipeline.
        packed = _noid_pallas_call(kernel, nb, TB, F, H, B_pad, vmem_limit,
                                   single_buffer_weights=False)(*args)

    raw = packed[0, :B].reshape(B, 1)
    logits = packed[1, :B].reshape(B, 1)
    loss = jnp.sum(packed[2, :]) / B                    # padded columns zeroed in-kernel
    out = {"loss": loss, "logits": logits, "raw": raw}
    if indexes is not None:
        out["indexes"] = indexes
    return out


def init_params(key, flen, hidden):
    """Deterministic parameter init matching nn.Linear shapes."""
    k1, k2, k3, k4 = jax.random.split(key, 4)
    lim1 = 1.0 / jnp.sqrt(flen)
    lim2 = 1.0 / jnp.sqrt(hidden)
    return {
        "w1": jax.random.uniform(k1, (flen, hidden), jnp.float32, -lim1, lim1),
        "b1": jax.random.uniform(k2, (1, hidden), jnp.float32, -lim1, lim1),
        "w2": jax.random.uniform(k3, (hidden, 1), jnp.float32, -lim2, lim2),
        "b2": jax.random.uniform(k4, (1, 1), jnp.float32, -lim2, lim2),
    }


if __name__ == "__main__":
    # Small synthetic config: flen=4 features, hidden=32, batch=8.
    B, FLEN, HIDDEN = 8, 4, 32
    WEIGHT_DECAY = 0.1

    key = jax.random.PRNGKey(0)
    kx, ky, kp, _ = jax.random.split(key, 4)

    finputs = jax.random.normal(kx, (B, FLEN), jnp.float32)
    labels = (jax.random.uniform(ky, (B,)) > 0.5).astype(jnp.float32)
    indexes = jnp.arange(B, dtype=jnp.int32)   # passed through untouched, like the module
    idinputs = None                            # unused by NoID.predict
    params = init_params(kp, FLEN, HIDDEN)

    out = noid_forward(finputs, idinputs, labels, indexes, params, WEIGHT_DECAY)
    jax.block_until_ready(out["loss"])
    jax.block_until_ready(out["logits"])
    jax.block_until_ready(out["raw"])

    # Reference (pure JAX, float32) for parity with the PyTorch module.
    h_ref = jnp.maximum(finputs @ params["w1"] + params["b1"], 0.0)
    raw_ref = h_ref @ params["w2"] + params["b2"]
    p_ref = jax.nn.sigmoid(raw_ref)
    w_ref = jnp.where(labels != 0.0, labels, WEIGHT_DECAY)
    bce_ref = -(labels * jnp.log(p_ref[:, 0]) + (1 - labels) * jnp.log(1 - p_ref[:, 0]))
    loss_ref = jnp.mean(w_ref * bce_ref)
    assert jnp.allclose(out["raw"], raw_ref, atol=1e-5)
    assert jnp.allclose(out["logits"], p_ref, atol=1e-5)
    assert jnp.allclose(out["loss"], loss_ref, atol=1e-5)
    assert jnp.array_equal(out["indexes"], indexes)

    # Explicit opt-in bf16 matmul path (changes numerics, so looser tolerance).
    out_bf16 = noid_forward(finputs, idinputs, labels, indexes, params, WEIGHT_DECAY,
                            use_bf16_matmul=True)
    jax.block_until_ready(out_bf16["loss"])
    assert jnp.allclose(out_bf16["raw"], raw_ref, atol=5e-2, rtol=5e-2)
    assert jnp.allclose(out_bf16["loss"], loss_ref, atol=5e-2, rtol=5e-2)

    print("KERNEL_OK")
</pallas_src>

<mosaic_0001>
module attributes {stable_mosaic.version = 11 : i64} {
  func.func @kernel(%arg0: i32, %arg1: memref<1x1xf32, #tpu.memory_space<smem>>, %arg2: memref<1x1xf32, #tpu.memory_space<smem>>, %arg3: memref<128x4xf32, #tpu.memory_space<vmem>>, %arg4: memref<32x4xf32, #tpu.memory_space<vmem>>, %arg5: memref<32x1xf32, #tpu.memory_space<vmem>>, %arg6: memref<32x1xf32, #tpu.memory_space<vmem>>, %arg7: memref<1x128xf32, #tpu.memory_space<vmem>>, %arg8: memref<3x128xf32, #tpu.memory_space<vmem>>) attributes {dimension_semantics = [#tpu.dimension_semantics<parallel>], iteration_bounds = array<i64: 1>, scalar_prefetch = 0 : i64, scratch_operands = 0 : i64, tpu.core_type = #tpu.core_type<tc>, window_params = [{transform_indices = @transform_0, window_bounds = array<i64: 1, 1>}, {transform_indices = @transform_1, window_bounds = array<i64: 1, 1>}, {transform_indices = @transform_2, window_bounds = array<i64: 128, 4>}, {pipeline_mode = #tpu.pipeline_mode<synchronous>, transform_indices = @transform_3, window_bounds = array<i64: 32, 4>}, {pipeline_mode = #tpu.pipeline_mode<synchronous>, transform_indices = @transform_4, window_bounds = array<i64: 32, 1>}, {pipeline_mode = #tpu.pipeline_mode<synchronous>, transform_indices = @transform_5, window_bounds = array<i64: 32, 1>}, {transform_indices = @transform_6, window_bounds = array<i64: 1, 128>}, {transform_indices = @transform_7, window_bounds = array<i64: 3, 128>}]} {
    %c0 = arith.constant 0 : index
    %c0_0 = arith.constant 0 : index
    %0 = vector.load %arg3[%c0, %c0_0] : memref<128x4xf32, #tpu.memory_space<vmem>>, vector<128x4xf32>
    %c0_1 = arith.constant 0 : index
    %c0_2 = arith.constant 0 : index
    %1 = vector.load %arg4[%c0_1, %c0_2] : memref<32x4xf32, #tpu.memory_space<vmem>>, vector<32x4xf32>
    %cst = arith.constant dense<0.000000e+00> : vector<32x128xf32>
    %2 = tpu.matmul %1, %0, %cst {dimension_numbers = #tpu.dot_dimension_numbers<[1], [1], [0], [0], [0, 0, 1, 0], [], []>} : vector<32x4xf32>, vector<128x4xf32>, vector<32x128xf32> -> vector<32x128xf32>
    %c0_3 = arith.constant 0 : index
    %c0_4 = arith.constant 0 : index
    %3 = vector.load %arg5[%c0_3, %c0_4] : memref<32x1xf32, #tpu.memory_space<vmem>>, vector<32x1xf32>
    %4 = vector.broadcast %3 : vector<32x1xf32> to vector<32x128xf32>
    %5 = arith.addf %2, %4 : vector<32x128xf32>
    %cst_5 = arith.constant 0.000000e+00 : f32
    %6 = vector.broadcast %cst_5 : f32 to vector<32x128xf32>
    %7 = arith.maximumf %5, %6 : vector<32x128xf32>
    %c0_6 = arith.constant 0 : index
    %c0_7 = arith.constant 0 : index
    %8 = vector.load %arg6[%c0_6, %c0_7] : memref<32x1xf32, #tpu.memory_space<vmem>>, vector<32x1xf32>
    %9 = vector.broadcast %8 : vector<32x1xf32> to vector<32x128xf32>
    %10 = arith.mulf %7, %9 : vector<32x128xf32>
    %cst_8 = arith.constant dense<0.000000e+00> : vector<128xf32>
    %11 = vector.multi_reduction <add>, %10, %cst_8 [0] : vector<32x128xf32> to vector<128xf32>
    %12 = vector.shape_cast %11 : vector<128xf32> to vector<1x128xf32>
    %c0_9 = arith.constant 0 : index
    %c0_10 = arith.constant 0 : index
    %13 = memref.load %arg2[%c0_9, %c0_10] : memref<1x1xf32, #tpu.memory_space<smem>>
    %14 = vector.broadcast %13 : f32 to vector<1x128xf32>
    %15 = arith.addf %12, %14 : vector<1x128xf32>
    %cst_11 = arith.constant 0.000000e+00 : f32
    %16 = vector.broadcast %cst_11 : f32 to vector<1x128xf32>
    %17 = arith.subf %16, %15 : vector<1x128xf32>
    %18 = math.exp %17 : vector<1x128xf32>
    %cst_12 = arith.constant 1.000000e+00 : f32
    %19 = vector.broadcast %cst_12 : f32 to vector<1x128xf32>
    %20 = arith.addf %19, %18 : vector<1x128xf32>
    %21 = tpu.reciprocal %20 : vector<1x128xf32> -> vector<1x128xf32>
    %c0_13 = arith.constant 0 : index
    %c0_14 = arith.constant 0 : index
    %22 = vector.load %arg7[%c0_13, %c0_14] : memref<1x128xf32, #tpu.memory_space<vmem>>, vector<1x128xf32>
    %cst_15 = arith.constant 0.000000e+00 : f32
    %23 = vector.broadcast %cst_15 : f32 to vector<1x128xf32>
    %24 = arith.cmpf one, %22, %23 : vector<1x128xf32>
    %c0_16 = arith.constant 0 : index
    %c0_17 = arith.constant 0 : index
    %25 = memref.load %arg1[%c0_16, %c0_17] : memref<1x1xf32, #tpu.memory_space<smem>>
    %26 = vector.broadcast %25 : f32 to vector<1x128xf32>
    %27 = arith.select %24, %22, %26 : vector<1x128xi1>, vector<1x128xf32>
    %28 = math.absf %15 : vector<1x128xf32>
    %cst_18 = arith.constant 0.000000e+00 : f32
    %29 = vector.broadcast %cst_18 : f32 to vector<1x128xf32>
    %30 = arith.subf %29, %28 : vector<1x128xf32>
    %31 = math.exp %30 : vector<1x128xf32>
    %cst_19 = arith.constant 1.000000e+00 : f32
    %32 = vector.broadcast %cst_19 : f32 to vector<1x128xf32>
    %33 = arith.addf %32, %31 : vector<1x128xf32>
    %34 = math.log %33 : vector<1x128xf32>
    %cst_20 = arith.constant 0.000000e+00 : f32
    %35 = vector.broadcast %cst_20 : f32 to vector<1x128xf32>
    %36 = arith.subf %35, %15 : vector<1x128xf32>
    %cst_21 = arith.constant 0.000000e+00 : f32
    %37 = vector.broadcast %cst_21 : f32 to vector<1x128xf32>
    %38 = arith.maximumf %36, %37 : vector<1x128xf32>
    %39 = arith.addf %38, %34 : vector<1x128xf32>
    %cst_22 = arith.constant 0.000000e+00 : f32
    %40 = vector.broadcast %cst_22 : f32 to vector<1x128xf32>
    %41 = arith.subf %40, %39 : vector<1x128xf32>
    %cst_23 = arith.constant -1.000000e+02 : f32
    %42 = vector.broadcast %cst_23 : f32 to vector<1x128xf32>
    %43 = arith.maximumf %41, %42 : vector<1x128xf32>
    %cst_24 = arith.constant 0.000000e+00 : f32
    %44 = vector.broadcast %cst_24 : f32 to vector<1x128xf32>
    %45 = arith.maximumf %15, %44 : vector<1x128xf32>
    %46 = arith.addf %45, %34 : vector<1x128xf32>
    %cst_25 = arith.constant 0.000000e+00 : f32
    %47 = vector.broadcast %cst_25 : f32 to vector<1x128xf32>
    %48 = arith.subf %47, %46 : vector<1x128xf32>
    %cst_26 = arith.constant -1.000000e+02 : f32
    %49 = vector.broadcast %cst_26 : f32 to vector<1x128xf32>
    %50 = arith.maximumf %48, %49 : vector<1x128xf32>
    %51 = arith.mulf %22, %43 : vector<1x128xf32>
    %cst_27 = arith.constant 1.000000e+00 : f32
    %52 = vector.broadcast %cst_27 : f32 to vector<1x128xf32>
    %53 = arith.subf %52, %22 : vector<1x128xf32>
    %54 = arith.mulf %53, %50 : vector<1x128xf32>
    %55 = arith.addf %51, %54 : vector<1x128xf32>
    %cst_28 = arith.constant 0.000000e+00 : f32
    %56 = vector.broadcast %cst_28 : f32 to vector<1x128xf32>
    %57 = arith.subf %56, %55 : vector<1x128xf32>
    %58 = arith.mulf %27, %57 : vector<1x128xf32>
    %59 = tpu.iota {dimensions = array<i32: 1>} : vector<1x128xi32>
    %c128_i32 = arith.constant 128 : i32
    %60 = arith.muli %arg0, %c128_i32 : i32
    %61 = vector.broadcast %60 : i32 to vector<1x128xi32>
    %62 = arith.addi %59, %61 : vector<1x128xi32>
    %c8_i32 = arith.constant 8 : i32
    %63 = vector.broadcast %c8_i32 : i32 to vector<1x128xi32>
    %64 = arith.cmpi slt, %62, %63 : vector<1x128xi32>
    %cst_29 = arith.constant 0.000000e+00 : f32
    %65 = vector.broadcast %cst_29 : f32 to vector<1x128xf32>
    %66 = arith.select %64, %58, %65 : vector<1x128xi1>, vector<1x128xf32>
    %c0_30 = arith.constant 0 : index
    %c0_31 = arith.constant 0 : index
    %67 = vector.load %arg8[%c0_30, %c0_31] : memref<3x128xf32, #tpu.memory_space<vmem>>, vector<1x128xf32>
    tpu.vector_store %arg8[%c0_30, %c0_31], %15 {strides = array<i32>} : memref<3x128xf32, #tpu.memory_space<vmem>>, vector<1x128xf32>,
    %c1 = arith.constant 1 : index
    %c0_32 = arith.constant 0 : index
    %68 = vector.load %arg8[%c1, %c0_32] : memref<3x128xf32, #tpu.memory_space<vmem>>, vector<1x128xf32>
    tpu.vector_store %arg8[%c1, %c0_32], %21 {strides = array<i32>} : memref<3x128xf32, #tpu.memory_space<vmem>>, vector<1x128xf32>,
    %c2 = arith.constant 2 : index
    %c0_33 = arith.constant 0 : index
    %69 = vector.load %arg8[%c2, %c0_33] : memref<3x128xf32, #tpu.memory_space<vmem>>, vector<1x128xf32>
    tpu.vector_store %arg8[%c2, %c0_33], %66 {strides = array<i32>} : memref<3x128xf32, #tpu.memory_space<vmem>>, vector<1x128xf32>,
    return
  }
  func.func @transform_0(%arg0: i32) -> (i32, i32) {
    %c0_i32 = arith.constant 0 : i32
    %c0_i32_0 = arith.constant 0 : i32
    %c0_i32_1 = arith.constant 0 : i32
    return %c0_i32, %c0_i32_0 : i32, i32
  }
  func.func @transform_1(%arg0: i32) -> (i32, i32) {
    %c0_i32 = arith.constant 0 : i32
    %c0_i32_0 = arith.constant 0 : i32
    %c0_i32_1 = arith.constant 0 : i32
    return %c0_i32, %c0_i32_0 : i32, i32
  }
  func.func @transform_2(%arg0: i32) -> (i32, i32) {
    %c0_i32 = arith.constant 0 : i32
    %c0_i32_0 = arith.constant 0 : i32
    return %arg0, %c0_i32 : i32, i32
  }
  func.func @transform_3(%arg0: i32) -> (i32, i32) {
    %c0_i32 = arith.constant 0 : i32
    %c0_i32_0 = arith.constant 0 : i32
    %c0_i32_1 = arith.constant 0 : i32
    return %c0_i32, %c0_i32_0 : i32, i32
  }
  func.func @transform_4(%arg0: i32) -> (i32, i32) {
    %c0_i32 = arith.constant 0 : i32
    %c0_i32_0 = arith.constant 0 : i32
    %c0_i32_1 = arith.constant 0 : i32
    return %c0_i32, %c0_i32_0 : i32, i32
  }
  func.func @transform_5(%arg0: i32) -> (i32, i32) {
    %c0_i32 = arith.constant 0 : i32
    %c0_i32_0 = arith.constant 0 : i32
    %c0_i32_1 = arith.constant 0 : i32
    return %c0_i32, %c0_i32_0 : i32, i32
  }
  func.func @transform_6(%arg0: i32) -> (i32, i32) {
    %c0_i32 = arith.constant 0 : i32
    %c0_i32_0 = arith.constant 0 : i32
    return %c0_i32, %arg0 : i32, i32
  }
  func.func @transform_7(%arg0: i32) -> (i32, i32) {
    %c0_i32 = arith.constant 0 : i32
    %c0_i32_0 = arith.constant 0 : i32
    return %c0_i32, %arg0 : i32, i32
  }
}

module attributes {stable_mosaic.version = 11 : i64} {
  func.func @kernel(%arg0: i32, %arg1: memref<1x1xf32, #tpu.memory_space<smem>>, %arg2: memref<1x1xf32, #tpu.memory_space<smem>>, %arg3: memref<128x4xf32, #tpu.memory_space<vmem>>, %arg4: memref<32x4xf32, #tpu.memory_space<vmem>>, %arg5: memref<32x1xf32, #tpu.memory_space<vmem>>, %arg6: memref<32x1xf32, #tpu.memory_space<vmem>>, %arg7: memref<1x128xf32, #tpu.memory_space<vmem>>, %arg8: memref<3x128xf32, #tpu.memory_space<vmem>>) attributes {dimension_semantics = [#tpu.dimension_semantics<parallel>], iteration_bounds = array<i64: 1>, scalar_prefetch = 0 : i64, scratch_operands = 0 : i64, tpu.core_type = #tpu.core_type<tc>, window_params = [{transform_indices = @transform_0, window_bounds = array<i64: 1, 1>}, {transform_indices = @transform_1, window_bounds = array<i64: 1, 1>}, {transform_indices = @transform_2, window_bounds = array<i64: 128, 4>}, {pipeline_mode = #tpu.pipeline_mode<synchronous>, transform_indices = @transform_3, window_bounds = array<i64: 32, 4>}, {pipeline_mode = #tpu.pipeline_mode<synchronous>, transform_indices = @transform_4, window_bounds = array<i64: 32, 1>}, {pipeline_mode = #tpu.pipeline_mode<synchronous>, transform_indices = @transform_5, window_bounds = array<i64: 32, 1>}, {transform_indices = @transform_6, window_bounds = array<i64: 1, 128>}, {transform_indices = @transform_7, window_bounds = array<i64: 3, 128>}]} {
    %c0 = arith.constant 0 : index
    %c0_0 = arith.constant 0 : index
    %0 = vector.load %arg3[%c0, %c0_0] : memref<128x4xf32, #tpu.memory_space<vmem>>, vector<128x4xf32>
    %c0_1 = arith.constant 0 : index
    %c0_2 = arith.constant 0 : index
    %1 = vector.load %arg4[%c0_1, %c0_2] : memref<32x4xf32, #tpu.memory_space<vmem>>, vector<32x4xf32>
    %cst = arith.constant dense<0.000000e+00> : vector<32x128xf32>
    %2 = tpu.matmul %1, %0, %cst {dimension_numbers = #tpu.dot_dimension_numbers<[1], [1], [0], [0], [0, 0, 1, 0], [], []>} : vector<32x4xf32>, vector<128x4xf32>, vector<32x128xf32> -> vector<32x128xf32>
    %c0_3 = arith.constant 0 : index
    %c0_4 = arith.constant 0 : index
    %3 = vector.load %arg5[%c0_3, %c0_4] : memref<32x1xf32, #tpu.memory_space<vmem>>, vector<32x1xf32>
    %4 = vector.broadcast %3 : vector<32x1xf32> to vector<32x128xf32>
    %5 = arith.addf %2, %4 : vector<32x128xf32>
    %cst_5 = arith.constant 0.000000e+00 : f32
    %6 = vector.broadcast %cst_5 : f32 to vector<32x128xf32>
    %7 = arith.maximumf %5, %6 : vector<32x128xf32>
    %c0_6 = arith.constant 0 : index
    %c0_7 = arith.constant 0 : index
    %8 = vector.load %arg6[%c0_6, %c0_7] : memref<32x1xf32, #tpu.memory_space<vmem>>, vector<32x1xf32>
    %9 = vector.broadcast %8 : vector<32x1xf32> to vector<32x128xf32>
    %10 = arith.mulf %7, %9 : vector<32x128xf32>
    %cst_8 = arith.constant dense<0.000000e+00> : vector<128xf32>
    %11 = vector.multi_reduction <add>, %10, %cst_8 [0] : vector<32x128xf32> to vector<128xf32>
    %12 = vector.shape_cast %11 : vector<128xf32> to vector<1x128xf32>
    %c0_9 = arith.constant 0 : index
    %c0_10 = arith.constant 0 : index
    %13 = memref.load %arg2[%c0_9, %c0_10] : memref<1x1xf32, #tpu.memory_space<smem>>
    %14 = vector.broadcast %13 : f32 to vector<1x128xf32>
    %15 = arith.addf %12, %14 : vector<1x128xf32>
    %cst_11 = arith.constant 0.000000e+00 : f32
    %16 = vector.broadcast %cst_11 : f32 to vector<1x128xf32>
    %17 = arith.subf %16, %15 : vector<1x128xf32>
    %18 = math.exp %17 : vector<1x128xf32>
    %cst_12 = arith.constant 1.000000e+00 : f32
    %19 = vector.broadcast %cst_12 : f32 to vector<1x128xf32>
    %20 = arith.addf %19, %18 : vector<1x128xf32>
    %21 = tpu.reciprocal %20 : vector<1x128xf32> -> vector<1x128xf32>
    %c0_13 = arith.constant 0 : index
    %c0_14 = arith.constant 0 : index
    %22 = vector.load %arg7[%c0_13, %c0_14] : memref<1x128xf32, #tpu.memory_space<vmem>>, vector<1x128xf32>
    %cst_15 = arith.constant 0.000000e+00 : f32
    %23 = vector.broadcast %cst_15 : f32 to vector<1x128xf32>
    %24 = arith.cmpf one, %22, %23 : vector<1x128xf32>
    %c0_16 = arith.constant 0 : index
    %c0_17 = arith.constant 0 : index
    %25 = memref.load %arg1[%c0_16, %c0_17] : memref<1x1xf32, #tpu.memory_space<smem>>
    %26 = vector.broadcast %25 : f32 to vector<1x128xf32>
    %27 = arith.select %24, %22, %26 : vector<1x128xi1>, vector<1x128xf32>
    %28 = math.absf %15 : vector<1x128xf32>
    %cst_18 = arith.constant 0.000000e+00 : f32
    %29 = vector.broadcast %cst_18 : f32 to vector<1x128xf32>
    %30 = arith.subf %29, %28 : vector<1x128xf32>
    %31 = math.exp %30 : vector<1x128xf32>
    %cst_19 = arith.constant 1.000000e+00 : f32
    %32 = vector.broadcast %cst_19 : f32 to vector<1x128xf32>
    %33 = arith.addf %32, %31 : vector<1x128xf32>
    %34 = math.log %33 : vector<1x128xf32>
    %cst_20 = arith.constant 0.000000e+00 : f32
    %35 = vector.broadcast %cst_20 : f32 to vector<1x128xf32>
    %36 = arith.subf %35, %15 : vector<1x128xf32>
    %cst_21 = arith.constant 0.000000e+00 : f32
    %37 = vector.broadcast %cst_21 : f32 to vector<1x128xf32>
    %38 = arith.maximumf %36, %37 : vector<1x128xf32>
    %39 = arith.addf %38, %34 : vector<1x128xf32>
    %cst_22 = arith.constant 0.000000e+00 : f32
    %40 = vector.broadcast %cst_22 : f32 to vector<1x128xf32>
    %41 = arith.subf %40, %39 : vector<1x128xf32>
    %cst_23 = arith.constant -1.000000e+02 : f32
    %42 = vector.broadcast %cst_23 : f32 to vector<1x128xf32>
    %43 = arith.maximumf %41, %42 : vector<1x128xf32>
    %cst_24 = arith.constant 0.000000e+00 : f32
    %44 = vector.broadcast %cst_24 : f32 to vector<1x128xf32>
    %45 = arith.maximumf %15, %44 : vector<1x128xf32>
    %46 = arith.addf %45, %34 : vector<1x128xf32>
    %cst_25 = arith.constant 0.000000e+00 : f32
    %47 = vector.broadcast %cst_25 : f32 to vector<1x128xf32>
    %48 = arith.subf %47, %46 : vector<1x128xf32>
    %cst_26 = arith.constant -1.000000e+02 : f32
    %49 = vector.broadcast %cst_26 : f32 to vector<1x128xf32>
    %50 = arith.maximumf %48, %49 : vector<1x128xf32>
    %51 = arith.mulf %22, %43 : vector<1x128xf32>
    %cst_27 = arith.constant 1.000000e+00 : f32
    %52 = vector.broadcast %cst_27 : f32 to vector<1x128xf32>
    %53 = arith.subf %52, %22 : vector<1x128xf32>
    %54 = arith.mulf %53, %50 : vector<1x128xf32>
    %55 = arith.addf %51, %54 : vector<1x128xf32>
    %cst_28 = arith.constant 0.000000e+00 : f32
    %56 = vector.broadcast %cst_28 : f32 to vector<1x128xf32>
    %57 = arith.subf %56, %55 : vector<1x128xf32>
    %58 = arith.mulf %27, %57 : vector<1x128xf32>
    %59 = tpu.iota {dimensions = array<i32: 1>} : vector<1x128xi32>
    %c128_i32 = arith.constant 128 : i32
    %60 = arith.muli %arg0, %c128_i32 : i32
    %61 = vector.broadcast %60 : i32 to vector<1x128xi32>
    %62 = arith.addi %59, %61 : vector<1x128xi32>
    %c8_i32 = arith.constant 8 : i32
    %63 = vector.broadcast %c8_i32 : i32 to vector<1x128xi32>
    %64 = arith.cmpi slt, %62, %63 : vector<1x128xi32>
    %cst_29 = arith.constant 0.000000e+00 : f32
    %65 = vector.broadcast %cst_29 : f32 to vector<1x128xf32>
    %66 = arith.select %64, %58, %65 : vector<1x128xi1>, vector<1x128xf32>
    %c0_30 = arith.constant 0 : index
    %c0_31 = arith.constant 0 : index
    %67 = vector.load %arg8[%c0_30, %c0_31] : memref<3x128xf32, #tpu.memory_space<vmem>>, vector<1x128xf32>
    tpu.vector_store %arg8[%c0_30, %c0_31], %15 {strides = array<i32>} : memref<3x128xf32, #tpu.memory_space<vmem>>, vector<1x128xf32>,
    %c1 = arith.constant 1 : index
    %c0_32 = arith.constant 0 : index
    %68 = vector.load %arg8[%c1, %c0_32] : memref<3x128xf32, #tpu.memory_space<vmem>>, vector<1x128xf32>
    tpu.vector_store %arg8[%c1, %c0_32], %21 {strides = array<i32>} : memref<3x128xf32, #tpu.memory_space<vmem>>, vector<1x128xf32>,
    %c2 = arith.constant 2 : index
    %c0_33 = arith.constant 0 : index
    %69 = vector.load %arg8[%c2, %c0_33] : memref<3x128xf32, #tpu.memory_space<vmem>>, vector<1x128xf32>
    tpu.vector_store %arg8[%c2, %c0_33], %66 {strides = array<i32>} : memref<3x128xf32, #tpu.memory_space<vmem>>, vector<1x128xf32>,
    return
  }
  func.func @transform_0(%arg0: i32) -> (i32, i32) {
    %c0_i32 = arith.constant 0 : i32
    %c0_i32_0 = arith.constant 0 : i32
    %c0_i32_1 = arith.constant 0 : i32
    return %c0_i32, %c0_i32_0 : i32, i32
  }
  func.func @transform_1(%arg0: i32) -> (i32, i32) {
    %c0_i32 = arith.constant 0 : i32
    %c0_i32_0 = arith.constant 0 : i32
    %c0_i32_1 = arith.constant 0 : i32
    return %c0_i32, %c0_i32_0 : i32, i32
  }
  func.func @transform_2(%arg0: i32) -> (i32, i32) {
    %c0_i32 = arith.constant 0 : i32
    %c0_i32_0 = arith.constant 0 : i32
    return %arg0, %c0_i32 : i32, i32
  }
  func.func @transform_3(%arg0: i32) -> (i32, i32) {
    %c0_i32 = arith.constant 0 : i32
    %c0_i32_0 = arith.constant 0 : i32
    %c0_i32_1 = arith.constant 0 : i32
    return %c0_i32, %c0_i32_0 : i32, i32
  }
  func.func @transform_4(%arg0: i32) -> (i32, i32) {
    %c0_i32 = arith.constant 0 : i32
    %c0_i32_0 = arith.constant 0 : i32
    %c0_i32_1 = arith.constant 0 : i32
    return %c0_i32, %c0_i32_0 : i32, i32
  }
  func.func @transform_5(%arg0: i32) -> (i32, i32) {
    %c0_i32 = arith.constant 0 : i32
    %c0_i32_0 = arith.constant 0 : i32
    %c0_i32_1 = arith.constant 0 : i32
    return %c0_i32, %c0_i32_0 : i32, i32
  }
  func.func @transform_6(%arg0: i32) -> (i32, i32) {
    %c0_i32 = arith.constant 0 : i32
    %c0_i32_0 = arith.constant 0 : i32
    return %c0_i32, %arg0 : i32, i32
  }
  func.func @transform_7(%arg0: i32) -> (i32, i32) {
    %c0_i32 = arith.constant 0 : i32
    %c0_i32_0 = arith.constant 0 : i32
    return %c0_i32, %arg0 : i32, i32
  }
}

</mosaic_0001>

<bundles_post_ra>
// kernel: tpu_custom_call.1
= control target key start
LH: loop header
LB: loop body
LE: loop exit
PB: predicated region body
PF: predicated region fallthrough
CT: control target
= control target key end

     0   :  { %vm73_vm0 = vcmask 31744   ;;  %s590_s0 = inlined_call_operand.<no memory space> [shape: f32[1,1], index: 0, kind: input, shape index: {}]   ;;  %s591_s1 = inlined_call_operand.<no memory space> [shape: f32[1,1], index: 1, kind: input, shape index: {}]   ;;  %s592_s2 = inlined_call_operand.vmem [shape: f32[128,4], index: 2, kind: input, shape index: {}]   ;;  %s593_s3 = inlined_call_operand.vmem [shape: f32[32,4], index: 3, kind: input, shape index: {}]   ;;  %s594_s4 = inlined_call_operand.vmem [shape: f32[32,1], index: 4, kind: input, shape index: {}]   ;;  %s595_s5 = inlined_call_operand.vmem [shape: f32[32,1], index: 5, kind: input, shape index: {}]   ;;  %s596_s6 = inlined_call_operand.vmem [shape: f32[1,128], index: 6, kind: input, shape index: {}]   ;;  %s597_s7 = inlined_call_operand.hbm [shape: f32[3,128], index: 7, kind: output, shape index: {}]  }
   0x1   :  { %v44_v0 = vld [vmem:[%s592_s2 + $0x78] sm:$0xff]  ;;  %v43_v1 = vld [vmem:[%s592_s2 + $0x70] sm:$0xff] }
   0x2   :  { %277 = vmatpush.xpose.msk.msra.mxu0 %vm73_vm0, %v44_v0  ;;  %297 = vmatpush.xpose.msk.msra.mxu1 %vm73_vm0, %v44_v0 }
   0x3   :  { %298 = vmatpush.xpose.msk.msra.mxu2 %vm73_vm0, %v44_v0  ;;  %299 = vmatpush.xpose.msk.msra.mxu3 %vm73_vm0, %v44_v0 }
   0x4   :  { %14 = vsyncpa [#allocation5], 0  ;;  %v42_v2 = vld [vmem:[%s592_s2 + $0x68] sm:$0xff]  ;;  %v41_v3 = vld [vmem:[%s592_s2 + $0x60] sm:$0xff]  ;;  %v384_v7 = vmov 0   ;;  %v205_v61 = vstv %s591_s1  ;;  %s268_s14 = sshll.u32 %s597_s7, 4  ;;  %s269_s14 = int_to_ptr.hbm [resolvable:$true] %s268_s14 }
   0x5   :  { %v40_v4 = vld [vmem:[%s592_s2 + $0x58] sm:$0xff]  ;;  %v39_v5 = vld [vmem:[%s592_s2 + $0x50] sm:$0xff]  ;;  %v49_v6 = vld [vmem:[%s594_s4] sm:$0xff]  ;;  %347 = vset.pattern.permute.xlu0 %v384_v7  ;;  %348 = vset.pattern.permute.xlu1 %v384_v7 }
   0x6   :  { %278 = vmatpush.xpose.msk.msra.mxu0 %vm73_vm0, %v43_v1  ;;  %300 = vmatpush.xpose.msk.msra.mxu1 %vm73_vm0, %v43_v1  ;;  %v38_v8 = vld [vmem:[%s592_s2 + $0x48] sm:$0xff]  ;;  %v51_v9 = vld [vmem:[%s594_s4 + $0x10] sm:$0xff]  ;;  %v37_v10 = vld [vmem:[%s592_s2 + $0x40] sm:$0xff] }
   0x7   :  { %301 = vmatpush.xpose.msk.msra.mxu2 %vm73_vm0, %v43_v1  ;;  %302 = vmatpush.xpose.msk.msra.mxu3 %vm73_vm0, %v43_v1  ;;  %v50_v11 = vld [vmem:[%s594_s4 + $0x8] sm:$0xff]  ;;  %v36_v12 = vld [vmem:[%s592_s2 + $0x38] sm:$0xff]  ;;  %v169_v14 = vld [vmem:[%s595_s5 + $0x10] sm:$0xff] }
   0x8   :  { %55 = vperm.xlu0 %347, %v49_v6   ;;  %349 = vset.pattern.permute.xlu2 %v384_v7  ;;  %v52_v13 = vld [vmem:[%s594_s4 + $0x18] sm:$0xff]  ;;  %v167_v15 = vld [vmem:[%s595_s5] sm:$0xff]  ;;  %v35_v16 = vld [vmem:[%s592_s2 + $0x30] sm:$0xff] }
   0x9   :  { %65 = vperm.xlu1 %348, %v51_v9   ;;  %173 = vperm.xlu2 %349, %v167_v15   ;;  %v170_v17 = vld [vmem:[%s595_s5 + $0x18] sm:$0xff]  ;;  %v34_v18 = vld [vmem:[%s592_s2 + $0x28] sm:$0xff]  ;;  %v33_v20 = vld [vmem:[%s592_s2 + $0x20] sm:$0xff] }
   0xa   :  { %279 = vmatpush.xpose.msk.msra.mxu0 %vm73_vm0, %v42_v2  ;;  %303 = vmatpush.xpose.msk.msra.mxu1 %vm73_vm0, %v42_v2  ;;  %v168_v19 = vld [vmem:[%s595_s5 + $0x8] sm:$0xff]  ;;  %v32_v21 = vld [vmem:[%s592_s2 + $0x18] sm:$0xff]  ;;  %v31_v22 = vld [vmem:[%s592_s2 + $0x10] sm:$0xff] }
   0xb   :  { %304 = vmatpush.xpose.msk.msra.mxu2 %vm73_vm0, %v42_v2  ;;  %305 = vmatpush.xpose.msk.msra.mxu3 %vm73_vm0, %v42_v2  ;;  %v30_v23 = vld [vmem:[%s592_s2 + $0x8] sm:$0xff]  ;;  %v29_v24 = vld [vmem:[%s592_s2] sm:$0xff]  ;;  %v47_v27 = vld [vmem:[%s593_s3 + $0x10] sm:$0xff] }
   0xc   :  { %v45_v25 = vld [vmem:[%s593_s3] sm:$0xff]  ;;  %v46_v26 = vld [vmem:[%s593_s3 + $0x8] sm:$0xff]  ;;  %v48_v28 = vld [vmem:[%s593_s3 + $0x18] sm:$0xff] }
   0xe   :  { %280 = vmatpush.xpose.msk.msra.mxu0 %vm73_vm0, %v41_v3  ;;  %306 = vmatpush.xpose.msk.msra.mxu1 %vm73_vm0, %v41_v3 }
   0xf   :  { %307 = vmatpush.xpose.msk.msra.mxu2 %vm73_vm0, %v41_v3  ;;  %308 = vmatpush.xpose.msk.msra.mxu3 %vm73_vm0, %v41_v3 }
  0x10   :  { %60 = vperm.xlu0 %347, %v50_v11  }
  0x11   :  { %70 = vperm.xlu1 %348, %v52_v13   ;;  %178 = vperm.xlu2 %349, %v168_v19   ;;  %v225_v19 = vld [vmem:[%s596_s6] sm:$0x1]  ;;  %s385_s6 = smov [#allocation4]  }
  0x12   :  { %281 = vmatpush.xpose.msk.msra.mxu0 %vm73_vm0, %v40_v4  ;;  %309 = vmatpush.xpose.msk.msra.mxu1 %vm73_vm0, %v40_v4  ;;  %vm226_vm5 = vcmp.ne.f32.partialorder %v225_v19, 0.0  ;;  %s266_s11 = sshll.u32 %s385_s6, 4  ;;  %s267_s11 = int_to_ptr.vmem [resolvable:$true] %s266_s11 }
  0x13   :  { %310 = vmatpush.xpose.msk.msra.mxu2 %vm73_vm0, %v40_v4  ;;  %311 = vmatpush.xpose.msk.msra.mxu3 %vm73_vm0, %v40_v4 }
  0x16   :  { %282 = vmatpush.xpose.msk.msra.mxu0 %vm73_vm0, %v39_v5  ;;  %312 = vmatpush.xpose.msk.msra.mxu1 %vm73_vm0, %v39_v5 }
  0x17   :  { %313 = vmatpush.xpose.msk.msra.mxu2 %vm73_vm0, %v39_v5  ;;  %314 = vmatpush.xpose.msk.msra.mxu3 %vm73_vm0, %v39_v5 }
  0x18   :  { %183 = vperm.xlu0 %347, %v169_v14  }
  0x19   :  { %188 = vperm.xlu1 %348, %v170_v17  }
  0x1a   :  { %283 = vmatpush.xpose.msk.msra.mxu0 %vm73_vm0, %v38_v8  ;;  %315 = vmatpush.xpose.msk.msra.mxu1 %vm73_vm0, %v38_v8 }
  0x1b   :  { %316 = vmatpush.xpose.msk.msra.mxu2 %vm73_vm0, %v38_v8  ;;  %317 = vmatpush.xpose.msk.msra.mxu3 %vm73_vm0, %v38_v8 }
  0x1e   :  { %284 = vmatpush.xpose.msk.msra.mxu0 %vm73_vm0, %v37_v10  ;;  %318 = vmatpush.xpose.msk.msra.mxu1 %vm73_vm0, %v37_v10 }
  0x1f   :  { %319 = vmatpush.xpose.msk.msra.mxu2 %vm73_vm0, %v37_v10  ;;  %320 = vmatpush.xpose.msk.msra.mxu3 %vm73_vm0, %v37_v10 }
  0x22   :  { %285 = vmatpush.xpose.msk.msra.mxu0 %vm73_vm0, %v36_v12  ;;  %321 = vmatpush.xpose.msk.msra.mxu1 %vm73_vm0, %v36_v12 }
  0x23   :  { %322 = vmatpush.xpose.msk.msra.mxu2 %vm73_vm0, %v36_v12  ;;  %323 = vmatpush.xpose.msk.msra.mxu3 %vm73_vm0, %v36_v12 }
  0x26   :  { %286 = vmatpush.xpose.msk.msra.mxu0 %vm73_vm0, %v35_v16  ;;  %324 = vmatpush.xpose.msk.msra.mxu1 %vm73_vm0, %v35_v16 }
  0x27   :  { %325 = vmatpush.xpose.msk.msra.mxu2 %vm73_vm0, %v35_v16  ;;  %326 = vmatpush.xpose.msk.msra.mxu3 %vm73_vm0, %v35_v16 }
  0x2a   :  { %287 = vmatpush.xpose.msk.msra.mxu0 %vm73_vm0, %v34_v18  ;;  %327 = vmatpush.xpose.msk.msra.mxu1 %vm73_vm0, %v34_v18 }
  0x2b   :  { %328 = vmatpush.xpose.msk.msra.mxu2 %vm73_vm0, %v34_v18  ;;  %329 = vmatpush.xpose.msk.msra.mxu3 %vm73_vm0, %v34_v18 }
  0x2e   :  { %288 = vmatpush.xpose.msk.msra.mxu0 %vm73_vm0, %v33_v20  ;;  %330 = vmatpush.xpose.msk.msra.mxu1 %vm73_vm0, %v33_v20 }
  0x2f   :  { %331 = vmatpush.xpose.msk.msra.mxu2 %vm73_vm0, %v33_v20  ;;  %332 = vmatpush.xpose.msk.msra.mxu3 %vm73_vm0, %v33_v20 }
  0x32   :  { %289 = vmatpush.xpose.msk.msra.mxu0 %vm73_vm0, %v32_v21  ;;  %333 = vmatpush.xpose.msk.msra.mxu1 %vm73_vm0, %v32_v21 }
  0x33   :  { %334 = vmatpush.xpose.msk.msra.mxu2 %vm73_vm0, %v32_v21  ;;  %335 = vmatpush.xpose.msk.msra.mxu3 %vm73_vm0, %v32_v21 }
  0x36   :  { %290 = vmatpush.xpose.msk.msra.mxu0 %vm73_vm0, %v31_v22  ;;  %336 = vmatpush.xpose.msk.msra.mxu1 %vm73_vm0, %v31_v22 }
  0x37   :  { %337 = vmatpush.xpose.msk.msra.mxu2 %vm73_vm0, %v31_v22  ;;  %338 = vmatpush.xpose.msk.msra.mxu3 %vm73_vm0, %v31_v22 }
  0x3a   :  { %291 = vmatpush.xpose.msk.msra.mxu0 %vm73_vm0, %v30_v23  ;;  %339 = vmatpush.xpose.msk.msra.mxu1 %vm73_vm0, %v30_v23 }
  0x3b   :  { %340 = vmatpush.xpose.msk.msra.mxu2 %vm73_vm0, %v30_v23  ;;  %341 = vmatpush.xpose.msk.msra.mxu3 %vm73_vm0, %v30_v23 }
  0x3e   :  { %292 = vmatpush.xpose.msk.msra.mxu0 %vm73_vm0, %v29_v24  ;;  %342 = vmatpush.xpose.msk.msra.mxu1 %vm73_vm0, %v29_v24 }
  0x3f   :  { %343 = vmatpush.xpose.msk.msra.mxu2 %vm73_vm0, %v29_v24  ;;  %344 = vmatpush.xpose.msk.msra.mxu3 %vm73_vm0, %v29_v24 }
  0x41   :  { %293 = vmatmul.msk.f32.vlgmr.msra.gmra.mxu0 %vm73_vm0, %v45_v25  ;;  %294 = vmatmul.msk.f32.vlgmr.msra.gmra.mxu1 %vm73_vm0, %v46_v26  ;;  %v246_v26 = vsub.f32 1.0, %v225_v19 }
  0x42   :  { %295 = vmatmul.msk.f32.vlgmr.msra.gmra.mxu2 %vm73_vm0, %v47_v27  ;;  %296 = vmatmul.msk.f32.vlgmr.msra.gmra.mxu3 %vm73_vm0, %v48_v28  ;;  %v251_v28 = vlaneseq }
  0x63   :  { %v174_v31 = vpop.permute.xlu2 %173 }
  0x6b   :  { %v179_v40 = vpop.permute.xlu2 %178 }
  0x7a   :  { %v56_v29 = vpop.permute.xlu0 %55 }
  0x7b   :  { %v66_v30 = vpop.permute.xlu1 %65 }
  0x82   :  { %v61_v32 = vpop.permute.xlu0 %60 }
  0x83   :  { %v71_v37 = vpop.permute.xlu1 %70 }
  0x8a   :  { %v184_v49 = vpop.permute.xlu0 %183 }
  0x8b   :  { %v189_v52 = vpop.permute.xlu1 %188 }
  0xbe   :  { %v151_v33 = vpop.f32.mrf.mxu0  ;;  %v154_v34 = vpop.f32.mrf.mxu1 }
  0xbf   :  { %v152_v35 = vadd.f32 %v151_v33, %v56_v29  ;;  %v155_v36 = vadd.f32 %v154_v34, %v61_v32  ;;  %v228_v32 = vstv %s590_s0 }
  0xc1   :  { %v163_v38 = vmax.f32 %v152_v35, 0.0  ;;  %v164_v39 = vmax.f32 %v155_v36, 0.0  ;;  %v252_v35 = vand.u32 127, %v251_v28 }
  0xc3   :  { %v191_v43 = vmul.f32 %v174_v31, %v163_v38  ;;  %v192_v44 = vmul.f32 %v179_v40, %v164_v39  ;;  %vm256_vm6 = vcmp.lt.s32.totalorder %v252_v35, 8 }
  0xc5   :  { %v157_v41 = vpop.f32.mrf.mxu2  ;;  %v160_v42 = vpop.f32.mrf.mxu3  ;;  %v195_v50 = vadd.f32 %v192_v44, %v191_v43 }
  0xc6   :  { %v158_v45 = vadd.f32 %v157_v41, %v66_v30  ;;  %v161_v46 = vadd.f32 %v160_v42, %v71_v37  ;;  %v229_v37 = vsel %vm226_vm5, %v225_v19, %v228_v32 }
  0xc8   :  { %v165_v47 = vmax.f32 %v158_v45, 0.0  ;;  %v166_v48 = vmax.f32 %v161_v46, 0.0 }
  0xca   :  { %v193_v51 = vmul.f32 %v184_v49, %v165_v47  ;;  %v194_v54 = vmul.f32 %v189_v52, %v166_v48 }
  0xcc   :  { %v196_v53 = vadd.f32 %v195_v50, %v193_v51 }
  0xce   :  { %v197_v55 = vadd.f32 %v196_v53, %v194_v54 }
  0xd0   :  { %v198_v56 = vrot.slane %v197_v55, 4 }
  0xd2   :  { %v199_v57 = vadd.f32 %v198_v56, %v197_v55 }
  0xd4   :  { %v200_v58 = vrot.slane %v199_v57, 2 }
  0xd6   :  { %v201_v59 = vadd.f32 %v200_v58, %v199_v57 }
  0xd8   :  { %v202_v60 = vrot.slane %v201_v59, 1 }
  0xda   :  { %v203_v62 = vadd.f32 %v202_v60, %v201_v59 }
  0xdc   :  { %v206_v63 = vadd.f32 %v205_v61, %v203_v62 }
  0xde   :  { %v207_v0 = vsub.f32 0.0, %v206_v63  ;;  %v230_v1 = vand.u32 2147483647, %v206_v63  ;;  %258 = vst [vmem:[#allocation4] sm:$0x1] %v206_v63  ;;  %v241_v16 = vmax.f32 %v206_v63, 0.0 }
  0xe0   :  { %v208_v2 = vmul.f32 1.442695, %v207_v0  ;;  %v231_v3 = vsub.f32 0.0, %v230_v1  ;;  %v237_v15 = vmax.f32 %v207_v0, 0.0 }
  0xe2   :  { %350 = vpow2.f32 %v208_v2  ;;  %v232_v4 = vmul.f32 1.442695, %v231_v3 }
  0xe4   :  { %352 = vpow2.f32 %v232_v4 }
  0xe8   :  { %v351_v5 = vpop.eup %350 }
  0xe9   :  { %v210_v6 = vadd.f32 1.0, %v351_v5 }
  0xea   :  { %v353_v7 = vpop.eup %352 }
  0xeb   :  { %354 = vrcp.f32 %v210_v6  ;;  %v234_v8 = vadd.f32 1.0, %v353_v7  ;;  %v222_v13 = vand.u32 2147483648, %v210_v6  ;;  %v220_v18 = vand.u32 2147483647, %v210_v6 }
  0xec   :  { %vm216_vm2 = vweird.f32 %v210_v6 }
  0xed   :  { %356 = vlog2.f32 %v234_v8  ;;  %v223_v23 = vor.u32 1.1754944e-38, %v222_v13  ;;  %vm221_vm4 = vcmp.eq.f32.partialorder %v220_v18, 8.507059e+37 }
  0xf1   :  { %v355_v9 = vpop.eup %354 }
  0xf2   :  { %v212_v10 = vmul.f32 %v355_v9, %v210_v6  ;;  %vm217_vm1 = vweird.f32 %v355_v9 }
  0xf3   :  { %v357_v11 = vpop.eup %356  ;;  %vm218_vm3 = vmor %vm216_vm2, %vm217_vm1 }
  0xf4   :  { %v213_v12 = vsub.f32 1.0, %v212_v10  ;;  %v236_v14 = vmul.f32 0.6931472, %v357_v11 }
  0xf6   :  { %v214_v17 = vmul.f32 %v355_v9, %v213_v12  ;;  %v238_v20 = vadd.f32 %v237_v15, %v236_v14  ;;  %v242_v21 = vadd.f32 %v241_v16, %v236_v14 }
  0xf8   :  { %v215_v22 = vadd.f32 %v355_v9, %v214_v17  ;;  %v239_v24 = vsub.f32 0.0, %v238_v20  ;;  %v243_v25 = vsub.f32 0.0, %v242_v21 }
  0xfa   :  { %v219_v27 = vsel %vm218_vm3, %v355_v9, %v215_v22  ;;  %v240_v30 = vmax.f32 %v239_v24, -100.0  ;;  %v244_v31 = vmax.f32 %v243_v25, -100.0 }
  0xfb   :  { %v224_v29 = vsel %vm221_vm4, %v223_v23, %v219_v27 }
  0xfc   :  { %259 = vst [vmem:[#allocation4 + $0x1] sm:$0x1] %v224_v29  ;;  %v245_v33 = vmul.f32 %v240_v30, %v225_v19  ;;  %v247_v34 = vmul.f32 %v246_v26, %v244_v31 }
  0xfe   :  { %v248_v36 = vadd.f32 %v247_v34, %v245_v33 }
 0x100   :  { %v249_v38 = vsub.f32 0.0, %v248_v36 }
 0x102   :  { %v250_v39 = vmul.f32 %v249_v38, %v229_v37 }
 0x104   :  { %v257_v40 = vsel %vm256_vm6, %v250_v39, 0.0 }
 0x105   :  { %260 = vst [vmem:[#allocation4 + $0x2] sm:$0x1] %v257_v40 }
 0x106   :  { %271 = dma.vmem_to_hbm [thread:$0]  %s267_s11, 64, %s269_s14, [#allocation5]  }
 0x107   :  { %382 = dma.done.wait [#allocation5], 64  }
 0x108   :  { %383 = vsyncadd [#allocation5], 4294967232 }
 0x109   :  { %276 = vsyncpa [#allocation5], 1 }

// kernel: tpu_custom_call.1
= control target key start
LH: loop header
LB: loop body
LE: loop exit
PB: predicated region body
PF: predicated region fallthrough
CT: control target
= control target key end

     0   :  { %vm73_vm0 = vcmask 31744   ;;  %s590_s0 = inlined_call_operand.<no memory space> [shape: f32[1,1], index: 0, kind: input, shape index: {}]   ;;  %s591_s1 = inlined_call_operand.<no memory space> [shape: f32[1,1], index: 1, kind: input, shape index: {}]   ;;  %s592_s2 = inlined_call_operand.vmem [shape: f32[128,4], index: 2, kind: input, shape index: {}]   ;;  %s593_s3 = inlined_call_operand.vmem [shape: f32[32,4], index: 3, kind: input, shape index: {}]   ;;  %s594_s4 = inlined_call_operand.vmem [shape: f32[32,1], index: 4, kind: input, shape index: {}]   ;;  %s595_s5 = inlined_call_operand.vmem [shape: f32[32,1], index: 5, kind: input, shape index: {}]   ;;  %s596_s6 = inlined_call_operand.vmem [shape: f32[1,128], index: 6, kind: input, shape index: {}]   ;;  %s597_s7 = inlined_call_operand.hbm [shape: f32[3,128], index: 7, kind: output, shape index: {}]  }
   0x1   :  { %v44_v0 = vld [vmem:[%s592_s2 + $0x78] sm:$0xff]  ;;  %v43_v1 = vld [vmem:[%s592_s2 + $0x70] sm:$0xff] }
   0x2   :  { %277 = vmatpush.xpose.msk.msra.mxu0 %vm73_vm0, %v44_v0  ;;  %297 = vmatpush.xpose.msk.msra.mxu1 %vm73_vm0, %v44_v0 }
   0x3   :  { %298 = vmatpush.xpose.msk.msra.mxu2 %vm73_vm0, %v44_v0  ;;  %299 = vmatpush.xpose.msk.msra.mxu3 %vm73_vm0, %v44_v0 }
   0x4   :  { %14 = vsyncpa [#allocation5], 0  ;;  %v42_v2 = vld [vmem:[%s592_s2 + $0x68] sm:$0xff]  ;;  %v41_v3 = vld [vmem:[%s592_s2 + $0x60] sm:$0xff]  ;;  %v384_v7 = vmov 0   ;;  %v205_v61 = vstv %s591_s1  ;;  %s268_s14 = sshll.u32 %s597_s7, 4  ;;  %s269_s14 = int_to_ptr.hbm [resolvable:$true] %s268_s14 }
   0x5   :  { %v40_v4 = vld [vmem:[%s592_s2 + $0x58] sm:$0xff]  ;;  %v39_v5 = vld [vmem:[%s592_s2 + $0x50] sm:$0xff]  ;;  %v49_v6 = vld [vmem:[%s594_s4] sm:$0xff]  ;;  %347 = vset.pattern.permute.xlu0 %v384_v7  ;;  %348 = vset.pattern.permute.xlu1 %v384_v7 }
   0x6   :  { %278 = vmatpush.xpose.msk.msra.mxu0 %vm73_vm0, %v43_v1  ;;  %300 = vmatpush.xpose.msk.msra.mxu1 %vm73_vm0, %v43_v1  ;;  %v38_v8 = vld [vmem:[%s592_s2 + $0x48] sm:$0xff]  ;;  %v51_v9 = vld [vmem:[%s594_s4 + $0x10] sm:$0xff]  ;;  %v37_v10 = vld [vmem:[%s592_s2 + $0x40] sm:$0xff] }
   0x7   :  { %301 = vmatpush.xpose.msk.msra.mxu2 %vm73_vm0, %v43_v1  ;;  %302 = vmatpush.xpose.msk.msra.mxu3 %vm73_vm0, %v43_v1  ;;  %v50_v11 = vld [vmem:[%s594_s4 + $0x8] sm:$0xff]  ;;  %v36_v12 = vld [vmem:[%s592_s2 + $0x38] sm:$0xff]  ;;  %v169_v14 = vld [vmem:[%s595_s5 + $0x10] sm:$0xff] }
   0x8   :  { %55 = vperm.xlu0 %347, %v49_v6   ;;  %349 = vset.pattern.permute.xlu2 %v384_v7  ;;  %v52_v13 = vld [vmem:[%s594_s4 + $0x18] sm:$0xff]  ;;  %v167_v15 = vld [vmem:[%s595_s5] sm:$0xff]  ;;  %v35_v16 = vld [vmem:[%s592_s2 + $0x30] sm:$0xff] }
   0x9   :  { %65 = vperm.xlu1 %348, %v51_v9   ;;  %173 = vperm.xlu2 %349, %v167_v15   ;;  %v170_v17 = vld [vmem:[%s595_s5 + $0x18] sm:$0xff]  ;;  %v34_v18 = vld [vmem:[%s592_s2 + $0x28] sm:$0xff]  ;;  %v33_v20 = vld [vmem:[%s592_s2 + $0x20] sm:$0xff] }
   0xa   :  { %279 = vmatpush.xpose.msk.msra.mxu0 %vm73_vm0, %v42_v2  ;;  %303 = vmatpush.xpose.msk.msra.mxu1 %vm73_vm0, %v42_v2  ;;  %v168_v19 = vld [vmem:[%s595_s5 + $0x8] sm:$0xff]  ;;  %v32_v21 = vld [vmem:[%s592_s2 + $0x18] sm:$0xff]  ;;  %v31_v22 = vld [vmem:[%s592_s2 + $0x10] sm:$0xff] }
   0xb   :  { %304 = vmatpush.xpose.msk.msra.mxu2 %vm73_vm0, %v42_v2  ;;  %305 = vmatpush.xpose.msk.msra.mxu3 %vm73_vm0, %v42_v2  ;;  %v30_v23 = vld [vmem:[%s592_s2 + $0x8] sm:$0xff]  ;;  %v29_v24 = vld [vmem:[%s592_s2] sm:$0xff]  ;;  %v47_v27 = vld [vmem:[%s593_s3 + $0x10] sm:$0xff] }
   0xc   :  { %v45_v25 = vld [vmem:[%s593_s3] sm:$0xff]  ;;  %v46_v26 = vld [vmem:[%s593_s3 + $0x8] sm:$0xff]  ;;  %v48_v28 = vld [vmem:[%s593_s3 + $0x18] sm:$0xff] }
   0xe   :  { %280 = vmatpush.xpose.msk.msra.mxu0 %vm73_vm0, %v41_v3  ;;  %306 = vmatpush.xpose.msk.msra.mxu1 %vm73_vm0, %v41_v3 }
   0xf   :  { %307 = vmatpush.xpose.msk.msra.mxu2 %vm73_vm0, %v41_v3  ;;  %308 = vmatpush.xpose.msk.msra.mxu3 %vm73_vm0, %v41_v3 }
  0x10   :  { %60 = vperm.xlu0 %347, %v50_v11  }
  0x11   :  { %70 = vperm.xlu1 %348, %v52_v13   ;;  %178 = vperm.xlu2 %349, %v168_v19   ;;  %v225_v19 = vld [vmem:[%s596_s6] sm:$0x1]  ;;  %s385_s6 = smov [#allocation4]  }
  0x12   :  { %281 = vmatpush.xpose.msk.msra.mxu0 %vm73_vm0, %v40_v4  ;;  %309 = vmatpush.xpose.msk.msra.mxu1 %vm73_vm0, %v40_v4  ;;  %vm226_vm5 = vcmp.ne.f32.partialorder %v225_v19, 0.0  ;;  %s266_s11 = sshll.u32 %s385_s6, 4  ;;  %s267_s11 = int_to_ptr.vmem [resolvable:$true] %s266_s11 }
  0x13   :  { %310 = vmatpush.xpose.msk.msra.mxu2 %vm73_vm0, %v40_v4  ;;  %311 = vmatpush.xpose.msk.msra.mxu3 %vm73_vm0, %v40_v4 }
  0x16   :  { %282 = vmatpush.xpose.msk.msra.mxu0 %vm73_vm0, %v39_v5  ;;  %312 = vmatpush.xpose.msk.msra.mxu1 %vm73_vm0, %v39_v5 }
  0x17   :  { %313 = vmatpush.xpose.msk.msra.mxu2 %vm73_vm0, %v39_v5  ;;  %314 = vmatpush.xpose.msk.msra.mxu3 %vm73_vm0, %v39_v5 }
  0x18   :  { %183 = vperm.xlu0 %347, %v169_v14  }
  0x19   :  { %188 = vperm.xlu1 %348, %v170_v17  }
  0x1a   :  { %283 = vmatpush.xpose.msk.msra.mxu0 %vm73_vm0, %v38_v8  ;;  %315 = vmatpush.xpose.msk.msra.mxu1 %vm73_vm0, %v38_v8 }
  0x1b   :  { %316 = vmatpush.xpose.msk.msra.mxu2 %vm73_vm0, %v38_v8  ;;  %317 = vmatpush.xpose.msk.msra.mxu3 %vm73_vm0, %v38_v8 }
  0x1e   :  { %284 = vmatpush.xpose.msk.msra.mxu0 %vm73_vm0, %v37_v10  ;;  %318 = vmatpush.xpose.msk.msra.mxu1 %vm73_vm0, %v37_v10 }
  0x1f   :  { %319 = vmatpush.xpose.msk.msra.mxu2 %vm73_vm0, %v37_v10  ;;  %320 = vmatpush.xpose.msk.msra.mxu3 %vm73_vm0, %v37_v10 }
  0x22   :  { %285 = vmatpush.xpose.msk.msra.mxu0 %vm73_vm0, %v36_v12  ;;  %321 = vmatpush.xpose.msk.msra.mxu1 %vm73_vm0, %v36_v12 }
  0x23   :  { %322 = vmatpush.xpose.msk.msra.mxu2 %vm73_vm0, %v36_v12  ;;  %323 = vmatpush.xpose.msk.msra.mxu3 %vm73_vm0, %v36_v12 }
  0x26   :  { %286 = vmatpush.xpose.msk.msra.mxu0 %vm73_vm0, %v35_v16  ;;  %324 = vmatpush.xpose.msk.msra.mxu1 %vm73_vm0, %v35_v16 }
  0x27   :  { %325 = vmatpush.xpose.msk.msra.mxu2 %vm73_vm0, %v35_v16  ;;  %326 = vmatpush.xpose.msk.msra.mxu3 %vm73_vm0, %v35_v16 }
  0x2a   :  { %287 = vmatpush.xpose.msk.msra.mxu0 %vm73_vm0, %v34_v18  ;;  %327 = vmatpush.xpose.msk.msra.mxu1 %vm73_vm0, %v34_v18 }
  0x2b   :  { %328 = vmatpush.xpose.msk.msra.mxu2 %vm73_vm0, %v34_v18  ;;  %329 = vmatpush.xpose.msk.msra.mxu3 %vm73_vm0, %v34_v18 }
  0x2e   :  { %288 = vmatpush.xpose.msk.msra.mxu0 %vm73_vm0, %v33_v20  ;;  %330 = vmatpush.xpose.msk.msra.mxu1 %vm73_vm0, %v33_v20 }
  0x2f   :  { %331 = vmatpush.xpose.msk.msra.mxu2 %vm73_vm0, %v33_v20  ;;  %332 = vmatpush.xpose.msk.msra.mxu3 %vm73_vm0, %v33_v20 }
  0x32   :  { %289 = vmatpush.xpose.msk.msra.mxu0 %vm73_vm0, %v32_v21  ;;  %333 = vmatpush.xpose.msk.msra.mxu1 %vm73_vm0, %v32_v21 }
  0x33   :  { %334 = vmatpush.xpose.msk.msra.mxu2 %vm73_vm0, %v32_v21  ;;  %335 = vmatpush.xpose.msk.msra.mxu3 %vm73_vm0, %v32_v21 }
  0x36   :  { %290 = vmatpush.xpose.msk.msra.mxu0 %vm73_vm0, %v31_v22  ;;  %336 = vmatpush.xpose.msk.msra.mxu1 %vm73_vm0, %v31_v22 }
  0x37   :  { %337 = vmatpush.xpose.msk.msra.mxu2 %vm73_vm0, %v31_v22  ;;  %338 = vmatpush.xpose.msk.msra.mxu3 %vm73_vm0, %v31_v22 }
  0x3a   :  { %291 = vmatpush.xpose.msk.msra.mxu0 %vm73_vm0, %v30_v23  ;;  %339 = vmatpush.xpose.msk.msra.mxu1 %vm73_vm0, %v30_v23 }
  0x3b   :  { %340 = vmatpush.xpose.msk.msra.mxu2 %vm73_vm0, %v30_v23  ;;  %341 = vmatpush.xpose.msk.msra.mxu3 %vm73_vm0, %v30_v23 }
  0x3e   :  { %292 = vmatpush.xpose.msk.msra.mxu0 %vm73_vm0, %v29_v24  ;;  %342 = vmatpush.xpose.msk.msra.mxu1 %vm73_vm0, %v29_v24 }
  0x3f   :  { %343 = vmatpush.xpose.msk.msra.mxu2 %vm73_vm0, %v29_v24  ;;  %344 = vmatpush.xpose.msk.msra.mxu3 %vm73_vm0, %v29_v24 }
  0x41   :  { %293 = vmatmul.msk.f32.vlgmr.msra.gmra.mxu0 %vm73_vm0, %v45_v25  ;;  %294 = vmatmul.msk.f32.vlgmr.msra.gmra.mxu1 %vm73_vm0, %v46_v26  ;;  %v246_v26 = vsub.f32 1.0, %v225_v19 }
  0x42   :  { %295 = vmatmul.msk.f32.vlgmr.msra.gmra.mxu2 %vm73_vm0, %v47_v27  ;;  %296 = vmatmul.msk.f32.vlgmr.msra.gmra.mxu3 %vm73_vm0, %v48_v28  ;;  %v251_v28 = vlaneseq }
  0x63   :  { %v174_v31 = vpop.permute.xlu2 %173 }
  0x6b   :  { %v179_v40 = vpop.permute.xlu2 %178 }
  0x7a   :  { %v56_v29 = vpop.permute.xlu0 %55 }
  0x7b   :  { %v66_v30 = vpop.permute.xlu1 %65 }
  0x82   :  { %v61_v32 = vpop.permute.xlu0 %60 }
  0x83   :  { %v71_v37 = vpop.permute.xlu1 %70 }
  0x8a   :  { %v184_v49 = vpop.permute.xlu0 %183 }
  0x8b   :  { %v189_v52 = vpop.permute.xlu1 %188 }
  0xbe   :  { %v151_v33 = vpop.f32.mrf.mxu0  ;;  %v154_v34 = vpop.f32.mrf.mxu1 }
  0xbf   :  { %v152_v35 = vadd.f32 %v151_v33, %v56_v29  ;;  %v155_v36 = vadd.f32 %v154_v34, %v61_v32  ;;  %v228_v32 = vstv %s590_s0 }
  0xc1   :  { %v163_v38 = vmax.f32 %v152_v35, 0.0  ;;  %v164_v39 = vmax.f32 %v155_v36, 0.0  ;;  %v252_v35 = vand.u32 127, %v251_v28 }
  0xc3   :  { %v191_v43 = vmul.f32 %v174_v31, %v163_v38  ;;  %v192_v44 = vmul.f32 %v179_v40, %v164_v39  ;;  %vm256_vm6 = vcmp.lt.s32.totalorder %v252_v35, 8 }
  0xc5   :  { %v157_v41 = vpop.f32.mrf.mxu2  ;;  %v160_v42 = vpop.f32.mrf.mxu3  ;;  %v195_v50 = vadd.f32 %v192_v44, %v191_v43 }
  0xc6   :  { %v158_v45 = vadd.f32 %v157_v41, %v66_v30  ;;  %v161_v46 = vadd.f32 %v160_v42, %v71_v37  ;;  %v229_v37 = vsel %vm226_vm5, %v225_v19, %v228_v32 }
  0xc8   :  { %v165_v47 = vmax.f32 %v158_v45, 0.0  ;;  %v166_v48 = vmax.f32 %v161_v46, 0.0 }
  0xca   :  { %v193_v51 = vmul.f32 %v184_v49, %v165_v47  ;;  %v194_v54 = vmul.f32 %v189_v52, %v166_v48 }
  0xcc   :  { %v196_v53 = vadd.f32 %v195_v50, %v193_v51 }
  0xce   :  { %v197_v55 = vadd.f32 %v196_v53, %v194_v54 }
  0xd0   :  { %v198_v56 = vrot.slane %v197_v55, 4 }
  0xd2   :  { %v199_v57 = vadd.f32 %v198_v56, %v197_v55 }
  0xd4   :  { %v200_v58 = vrot.slane %v199_v57, 2 }
  0xd6   :  { %v201_v59 = vadd.f32 %v200_v58, %v199_v57 }
  0xd8   :  { %v202_v60 = vrot.slane %v201_v59, 1 }
  0xda   :  { %v203_v62 = vadd.f32 %v202_v60, %v201_v59 }
  0xdc   :  { %v206_v63 = vadd.f32 %v205_v61, %v203_v62 }
  0xde   :  { %v207_v0 = vsub.f32 0.0, %v206_v63  ;;  %v230_v1 = vand.u32 2147483647, %v206_v63  ;;  %258 = vst [vmem:[#allocation4] sm:$0x1] %v206_v63  ;;  %v241_v16 = vmax.f32 %v206_v63, 0.0 }
  0xe0   :  { %v208_v2 = vmul.f32 1.442695, %v207_v0  ;;  %v231_v3 = vsub.f32 0.0, %v230_v1  ;;  %v237_v15 = vmax.f32 %v207_v0, 0.0 }
  0xe2   :  { %350 = vpow2.f32 %v208_v2  ;;  %v232_v4 = vmul.f32 1.442695, %v231_v3 }
  0xe4   :  { %352 = vpow2.f32 %v232_v4 }
  0xe8   :  { %v351_v5 = vpop.eup %350 }
  0xe9   :  { %v210_v6 = vadd.f32 1.0, %v351_v5 }
  0xea   :  { %v353_v7 = vpop.eup %352 }
  0xeb   :  { %354 = vrcp.f32 %v210_v6  ;;  %v234_v8 = vadd.f32 1.0, %v353_v7  ;;  %v222_v13 = vand.u32 2147483648, %v210_v6  ;;  %v220_v18 = vand.u32 2147483647, %v210_v6 }
  0xec   :  { %vm216_vm2 = vweird.f32 %v210_v6 }
  0xed   :  { %356 = vlog2.f32 %v234_v8  ;;  %v223_v23 = vor.u32 1.1754944e-38, %v222_v13  ;;  %vm221_vm4 = vcmp.eq.f32.partialorder %v220_v18, 8.507059e+37 }
  0xf1   :  { %v355_v9 = vpop.eup %354 }
  0xf2   :  { %v212_v10 = vmul.f32 %v355_v9, %v210_v6  ;;  %vm217_vm1 = vweird.f32 %v355_v9 }
  0xf3   :  { %v357_v11 = vpop.eup %356  ;;  %vm218_vm3 = vmor %vm216_vm2, %vm217_vm1 }
  0xf4   :  { %v213_v12 = vsub.f32 1.0, %v212_v10  ;;  %v236_v14 = vmul.f32 0.6931472, %v357_v11 }
  0xf6   :  { %v214_v17 = vmul.f32 %v355_v9, %v213_v12  ;;  %v238_v20 = vadd.f32 %v237_v15, %v236_v14  ;;  %v242_v21 = vadd.f32 %v241_v16, %v236_v14 }
  0xf8   :  { %v215_v22 = vadd.f32 %v355_v9, %v214_v17  ;;  %v239_v24 = vsub.f32 0.0, %v238_v20  ;;  %v243_v25 = vsub.f32 0.0, %v242_v21 }
  0xfa   :  { %v219_v27 = vsel %vm218_vm3, %v355_v9, %v215_v22  ;;  %v240_v30 = vmax.f32 %v239_v24, -100.0  ;;  %v244_v31 = vmax.f32 %v243_v25, -100.0 }
  0xfb   :  { %v224_v29 = vsel %vm221_vm4, %v223_v23, %v219_v27 }
  0xfc   :  { %259 = vst [vmem:[#allocation4 + $0x1] sm:$0x1] %v224_v29  ;;  %v245_v33 = vmul.f32 %v240_v30, %v225_v19  ;;  %v247_v34 = vmul.f32 %v246_v26, %v244_v31 }
  0xfe   :  { %v248_v36 = vadd.f32 %v247_v34, %v245_v33 }
 0x100   :  { %v249_v38 = vsub.f32 0.0, %v248_v36 }
 0x102   :  { %v250_v39 = vmul.f32 %v249_v38, %v229_v37 }
 0x104   :  { %v257_v40 = vsel %vm256_vm6, %v250_v39, 0.0 }
 0x105   :  { %260 = vst [vmem:[#allocation4 + $0x2] sm:$0x1] %v257_v40 }
 0x106   :  { %271 = dma.vmem_to_hbm [thread:$0]  %s267_s11, 64, %s269_s14, [#allocation5]  }
 0x107   :  { %382 = dma.done.wait [#allocation5], 64  }
 0x108   :  { %383 = vsyncadd [#allocation5], 4294967232 }
 0x109   :  { %276 = vsyncpa [#allocation5], 1 }

</bundles_post_ra>
